<compile_context>
chip_gen: v5e
topology: v5e:2x2
jax: 0.10.0
libtpu: 0.0.40
codegen_flags: <defaults>
</compile_context>

<pallas_src>
import functools
import math

import jax
import jax.numpy as jnp
import numpy as np
from jax import lax
from jax.experimental import pallas as pl
from jax.experimental.pallas import tpu as pltpu

F32_MIN = float(jnp.finfo(jnp.float32).min)  # torch.finfo(float32).min


def _gelu_exact(x):
    # F.gelu default (exact, erf-based)
    return 0.5 * x * (1.0 + lax.erf(x * (1.0 / math.sqrt(2.0))))


def _logaddexp(a, b):
    # torch.logaddexp (stable form; inputs are finite here)
    mx = jnp.maximum(a, b)
    return mx + jnp.log(jnp.exp(a - mx) + jnp.exp(b - mx))


# ---------------------------------------------------------------------------
# Tiled linear projection:  y = x @ w.T  (torch-layout w: (out_feat, in_feat))
# ---------------------------------------------------------------------------
def _linear_kernel(x_ref, w_ref, o_ref, acc_ref):
    @pl.when(pl.program_id(2) == 0)
    def _():
        acc_ref[...] = jnp.zeros_like(acc_ref)

    # contract x's last dim with w's last dim (weight used in torch layout)
    acc_ref[...] += lax.dot_general(
        x_ref[...], w_ref[...],
        dimension_numbers=(((1,), (1,)), ((), ())),
        preferred_element_type=jnp.float32)

    @pl.when(pl.program_id(2) == pl.num_programs(2) - 1)
    def _():
        o_ref[...] = acc_ref[...].astype(o_ref.dtype)


def _pick_tile(dim, pref, align):
    """Largest tile <= pref that divides dim and is a multiple of align (else full dim)."""
    if dim <= pref:
        return dim
    t = (pref // align) * align
    while t >= align:
        if dim % t == 0:
            return t
        t -= align
    return dim


def pallas_linear(x2d, w, *, tm=256, tn=512, tk=512):
    M, K = x2d.shape
    N = w.shape[0]
    tm = _pick_tile(M, tm, 8)
    tn = _pick_tile(N, tn, 128)
    tk = _pick_tile(K, tk, 128)
    grid = (M // tm, N // tn, K // tk)
    return pl.pallas_call(
        _linear_kernel,
        out_shape=jax.ShapeDtypeStruct((M, N), x2d.dtype),
        grid=grid,
        in_specs=[
            pl.BlockSpec((tm, tk), lambda i, j, k: (i, k)),
            pl.BlockSpec((tn, tk), lambda i, j, k: (j, k)),
        ],
        out_specs=pl.BlockSpec((tm, tn), lambda i, j, k: (i, j)),
        scratch_shapes=[pltpu.VMEM((tm, tn), jnp.float32)],
        compiler_params=pltpu.CompilerParams(
            dimension_semantics=("parallel", "parallel", "arbitrary")),
    )(x2d, w)


# ---------------------------------------------------------------------------
# LESS attention core kernel
# ---------------------------------------------------------------------------
def _less_attn_kernel(
    q_ref, k_ref, v_ref,            # (Hb, tq, D), (Hb, S, D), (Hb, S, D)
    wq1_ref, wk1_ref,               # (Hb, D, KH)
    wq2_ref, wk2_ref,               # (Hb, KH, KD)
    sD_ref,                         # (Hb, 1, KD)   scalingD
    inter_ref,                      # (Hb, KD, KD)  interaction_k
    sD2_ref,                        # (Hb, 1, KD)   scalingD2
    o_ref,                          # (tq, Hb*D)
    *,
    heavy_budget,
    recent_budget,
    fix_heavy_to_initial_tokens,
):
    Hb, tq, D = q_ref.shape
    S = k_ref.shape[1]
    q0 = pl.program_id(2) * tq      # global row offset of this query tile

    # masks rebuilt from iota (shared across the Hb heads of this step)
    row = lax.broadcasted_iota(jnp.int32, (tq, S), 0) + q0
    col = lax.broadcasted_iota(jnp.int32, (tq, S), 1)
    causal = col <= row                                  # == (attn_mask > mask_min) for S>1
    recent = (col - row) >= -recent_budget               # triu(-recent_budget)
    if heavy_budget > 0 and fix_heavy_to_initial_tokens:
        keep = jnp.logical_or(col < heavy_budget, recent)
    else:
        # TODO(synk): local_heavy_hitter_mask_nonoverlap (fix_heavy_to_initial_tokens=False)
        # is not defined in the provided source; that path degenerates to recent+causal.
        keep = recent
    sparse_mask = jnp.logical_and(keep, causal)
    if S > 1:
        lr_mask = jnp.logical_and(causal, jnp.logical_not(keep))
    else:
        # S == 1: torch reference has mask_min == 0 -> lr region is empty.
        lr_mask = jnp.zeros((tq, S), jnp.bool_)

    inv_sqrt_d = 1.0 / math.sqrt(D)
    outs = []
    for hh in range(Hb):                                  # static, unrolled
        q = q_ref[hh].astype(jnp.float32)                 # (tq, D)
        k = k_ref[hh].astype(jnp.float32)                 # (S, D)
        v = v_ref[hh].astype(jnp.float32)                 # (S, D)

        # sparse (fixed + recent + causal) branch
        s = jnp.dot(q, k.T, preferred_element_type=jnp.float32) * inv_sqrt_d
        sparse_w = jnp.where(sparse_mask, s, F32_MIN)
        row_max = jnp.max(sparse_w, axis=-1, keepdims=True)
        p = jnp.exp(sparse_w - row_max)                   # reused for LSE and for aw
        sparse_lse = row_max + jnp.log(jnp.sum(p, axis=-1, keepdims=True))

        # learned kernel feature maps (low-rank branch)
        q1 = _gelu_exact(jnp.dot(q, wq1_ref[hh], preferred_element_type=jnp.float32))
        k1 = _gelu_exact(jnp.dot(k, wk1_ref[hh], preferred_element_type=jnp.float32))
        qker = _gelu_exact(jnp.dot(q1, wq2_ref[hh], preferred_element_type=jnp.float32))
        kker = jnp.abs(sD_ref[hh]) * _gelu_exact(
            jnp.dot(k1, wk2_ref[hh], preferred_element_type=jnp.float32))
        kker = kker + jnp.dot(kker, inter_ref[hh],
                              preferred_element_type=jnp.float32) * sD2_ref[hh]

        lr_w = jnp.where(
            lr_mask,
            jnp.dot(jnp.abs(qker), jnp.abs(kker).T, preferred_element_type=jnp.float32),
            0.0)
        lr_lse = jnp.log(jnp.sum(lr_w, axis=-1, keepdims=True) + 1e-6)
        norms_lse = _logaddexp(lr_lse, sparse_lse)

        # aw == exp(where(lr, log(lr_w+1e-6), sparse_w) - norms_lse) without the
        # per-element log/exp round trip (per-row scales only).
        aw = jnp.where(lr_mask,
                       (lr_w + 1e-6) * jnp.exp(-norms_lse),
                       p * jnp.exp(row_max - norms_lse))
        outs.append(jnp.dot(aw, v, preferred_element_type=jnp.float32))

    out = outs[0] if Hb == 1 else jnp.concatenate(outs, axis=-1)
    o_ref[...] = out.astype(o_ref.dtype)


def _pick_head_block(H, D):
    """Heads per grid step so the output store (Hb*D columns) is lane-dense."""
    if H * D <= 128:
        return H
    for hb in range(1, H + 1):
        if H % hb == 0 and (hb * D) % 128 == 0:
            return hb
    return H


def _pick_q_tile(S, target=512):
    if S <= target:
        return S
    t = (target // 8) * 8
    while t >= 8:
        if S % t == 0:
            return t
        t -= 8
    return S


def less_attention_core(q, k, v, params, cfg):
    B, H, S, D = q.shape
    KH = cfg["ker_hid"]
    KD = cfg["ker_dim"]
    Hb = _pick_head_block(H, D)
    tq = _pick_q_tile(S)
    grid = (H // Hb, B, S // tq)   # head-major: per-head weights DMA'd once per head block

    kernel = functools.partial(
        _less_attn_kernel,
        heavy_budget=cfg["heavy_count"],
        recent_budget=cfg["recent_count"],
        fix_heavy_to_initial_tokens=cfg["fix_heavy_to_initial_tokens"],
    )

    in_specs = [
        pl.BlockSpec((None, Hb, tq, D), lambda hi, b, qi: (b, hi, qi, 0)),   # q
        pl.BlockSpec((None, Hb, S, D), lambda hi, b, qi: (b, hi, 0, 0)),     # k
        pl.BlockSpec((None, Hb, S, D), lambda hi, b, qi: (b, hi, 0, 0)),     # v
        pl.BlockSpec((Hb, D, KH), lambda hi, b, qi: (hi, 0, 0)),             # kernel_q_mat1
        pl.BlockSpec((Hb, D, KH), lambda hi, b, qi: (hi, 0, 0)),             # kernel_k_mat1
        pl.BlockSpec((Hb, KH, KD), lambda hi, b, qi: (hi, 0, 0)),            # kernel_q_mat2
        pl.BlockSpec((Hb, KH, KD), lambda hi, b, qi: (hi, 0, 0)),            # kernel_k_mat2
        pl.BlockSpec((None, Hb, 1, KD), lambda hi, b, qi: (0, hi, 0, 0)),    # scalingD
        pl.BlockSpec((Hb, KD, KD), lambda hi, b, qi: (hi, 0, 0)),            # interaction_k
        pl.BlockSpec((None, Hb, 1, KD), lambda hi, b, qi: (0, hi, 0, 0)),    # scalingD2
    ]
    # output written directly in (B, S, H*D) layout, lane-dense per head block
    out_spec = pl.BlockSpec((None, tq, Hb * D), lambda hi, b, qi: (b, qi, hi))

    return pl.pallas_call(
        kernel,
        grid=grid,
        in_specs=in_specs,
        out_specs=out_spec,
        out_shape=jax.ShapeDtypeStruct((B, S, H * D), jnp.float32),
        compiler_params=pltpu.CompilerParams(
            dimension_semantics=("parallel", "parallel", "parallel")),
    )(q, k, v,
      params["kernel_q_mat1"], params["kernel_k_mat1"],
      params["kernel_q_mat2"], params["kernel_k_mat2"],
      params["scalingD"], params["interaction_k"], params["scalingD2"])


# ---------------------------------------------------------------------------
# Glue: RoPE, projections, full forward
# ---------------------------------------------------------------------------
def _rotary_cos_sin(position_ids, head_dim):
    inv_freq = 1.0 / (10000.0 ** (jnp.arange(0, head_dim, 2, dtype=jnp.float32) / head_dim))
    freqs = position_ids.astype(jnp.float32)[..., None] * inv_freq[None, None, :]
    emb = jnp.concatenate([freqs, freqs], axis=-1)
    return jnp.cos(emb), jnp.sin(emb)


def _rotate_half(x):
    half = x.shape[-1] // 2
    return jnp.concatenate([-x[..., half:], x[..., :half]], axis=-1)


def _apply_rotary(q, k, cos, sin):
    cos = cos[:, None, :, :]
    sin = sin[:, None, :, :]
    return q * cos + _rotate_half(q) * sin, k * cos + _rotate_half(k) * sin


def llama_attention_less_forward(params, hidden_states, cfg, use_pallas=True):
    B, S, Hd = hidden_states.shape
    H = cfg["num_heads"]
    D = Hd // H

    x2d = hidden_states.reshape(B * S, Hd)
    # fused QKV projection (single read of the activations)
    if use_pallas:
        qkv = pallas_linear(x2d, params["wqkv"])
    else:
        qkv = x2d @ params["wqkv"].T
    qh, kh, vh = jnp.split(qkv, 3, axis=-1)

    to_heads = lambda t: t.reshape(B, S, H, D).transpose(0, 2, 1, 3)
    q, k, v = to_heads(qh), to_heads(kh), to_heads(vh)

    position_ids = jnp.broadcast_to(jnp.arange(S)[None, :], (B, S))
    cos, sin = _rotary_cos_sin(position_ids, D)
    q, k = _apply_rotary(q, k, cos, sin)

    if use_pallas:
        attn = less_attention_core(q, k, v, params, cfg)          # (B, S, Hd) directly
        out = pallas_linear(attn.reshape(B * S, Hd), params["wo"])
    else:
        # faithful torch-style reference path (explicit additive mask + log/exp)
        attn_mask = jnp.triu(jnp.ones((B, 1, S, S), jnp.float32), k=1) * -1000.0
        mask_min = jnp.min(attn_mask)
        attn = _reference_core(q, k, v, attn_mask, mask_min, params, cfg)  # (B,H,S,D)
        out = attn.transpose(0, 2, 1, 3).reshape(B * S, Hd) @ params["wo"].T
    return out.reshape(B, S, Hd)


# Plain-JAX reference of the attention core (mirrors the torch forward) used
# only to validate the Pallas kernel.
def _reference_core(q, k, v, attn_mask, mask_min, params, cfg):
    B, H, S, D = q.shape
    s = jnp.einsum("bhqd,bhkd->bhqk", q, k) / math.sqrt(D)
    s = s + attn_mask
    s = jnp.maximum(s, F32_MIN)

    row = lax.broadcasted_iota(jnp.int32, (S, S), 0)
    col = lax.broadcasted_iota(jnp.int32, (S, S), 1)
    mask_bottom = col < cfg["heavy_count"] if cfg["heavy_count"] > 0 else jnp.zeros((S, S), bool)
    mask_bottom = jnp.logical_or(mask_bottom, (col - row) >= -cfg["recent_count"])
    sparse_mask = jnp.logical_and(mask_bottom, col <= row)[None, None]

    sparse_w = jnp.where(sparse_mask, s, F32_MIN)
    rm = jnp.max(sparse_w, -1, keepdims=True)
    sparse_lse = rm + jnp.log(jnp.sum(jnp.exp(sparse_w - rm), -1, keepdims=True))

    lr_mask = jnp.logical_and(attn_mask > mask_min, jnp.logical_not(sparse_mask))

    g = _gelu_exact
    q1 = g(jnp.einsum("bhsd,hde->bhse", q, params["kernel_q_mat1"]))
    k1 = g(jnp.einsum("bhsd,hde->bhse", k, params["kernel_k_mat1"]))
    qker = g(jnp.einsum("bhsd,hde->bhse", q1, params["kernel_q_mat2"]))
    kker = jnp.abs(params["scalingD"]) * g(jnp.einsum("bhsd,hde->bhse", k1, params["kernel_k_mat2"]))
    kker = kker + jnp.einsum("bhsd,hde->bhse", kker, params["interaction_k"]) * params["scalingD2"]

    lr_w = jnp.where(lr_mask, jnp.einsum("bhqe,bhke->bhqk", jnp.abs(qker), jnp.abs(kker)), 0.0)
    lr_lse = jnp.log(jnp.sum(lr_w, -1, keepdims=True) + 1e-6)
    norms = _logaddexp(lr_lse, sparse_lse)
    aw = jnp.where(lr_mask, jnp.log(lr_w + 1e-6), sparse_w)
    aw = jnp.exp(aw - norms)
    return jnp.einsum("bhqk,bhkd->bhqd", aw, v)


# ---------------------------------------------------------------------------
# Deterministic parameter init (shapes from the module __init__)
# ---------------------------------------------------------------------------
def init_params(key, cfg):
    Hd = cfg["hidden_size"]
    H = cfg["num_heads"]
    D = Hd // H
    KH = cfg["ker_hid"]
    KD = cfg["ker_dim"]
    keys = jax.random.split(key, 10)
    u = lambda k, shape, a: jax.random.uniform(k, shape, jnp.float32, -a, a)

    a1 = math.sqrt(3.0 / (D + KD))
    a2 = math.sqrt(3.0 / (KH + KD))
    a3 = math.sqrt(6.0 / (2.0 * KD))
    wq = u(keys[0], (Hd, Hd), 1.0 / math.sqrt(Hd))
    wk = u(keys[1], (Hd, Hd), 1.0 / math.sqrt(Hd))
    wv = u(keys[2], (Hd, Hd), 1.0 / math.sqrt(Hd))
    return {
        "wqkv": jnp.concatenate([wq, wk, wv], axis=0),   # fused QKV (torch layout)
        "wo": u(keys[3], (Hd, Hd), 1.0 / math.sqrt(Hd)),
        "kernel_q_mat1": u(keys[4], (H, D, KH), a1),
        "kernel_k_mat1": u(keys[5], (H, D, KH), a1),
        "kernel_q_mat2": u(keys[6], (H, KH, KD), a2),
        "kernel_k_mat2": u(keys[7], (H, KH, KD), a2),
        "interaction_k": u(keys[8], (H, KD, KD), a3),
        "scalingD": jnp.ones((1, H, 1, KD), jnp.float32) * 1e-4,
        "scalingD2": jnp.ones((1, H, 1, KD), jnp.float32) * 1e-4,
    }


if __name__ == "__main__":
    cfg = dict(
        hidden_size=32,
        num_heads=4,
        ker_hid=16,
        ker_dim=8,                     # config.kernel_hidden_size
        fixed_count=1,
        heavy_count=2,
        recent_count=2,
        fix_heavy_to_initial_tokens=True,
        max_position_embeddings=128,
    )
    B, S = 2, 8

    key = jax.random.PRNGKey(0)
    pkey, xkey = jax.random.split(key)
    params = init_params(pkey, cfg)
    hidden_states = jax.random.normal(xkey, (B, S, cfg["hidden_size"]), jnp.float32)

    out = llama_attention_less_forward(params, hidden_states, cfg, use_pallas=True)
    out = jax.block_until_ready(out)

    ref = llama_attention_less_forward(params, hidden_states, cfg, use_pallas=False)
    ref = jax.block_until_ready(ref)

    np.testing.assert_allclose(np.asarray(out), np.asarray(ref), rtol=2e-4, atol=1e-4)
    assert out.shape == (B, S, cfg["hidden_size"])
    print("KERNEL_OK")
</pallas_src>

<mosaic_0001>
module attributes {stable_mosaic.version = 11 : i64} {
  func.func @_linear_kernel(%arg0: i32, %arg1: i32, %arg2: i32, %arg3: memref<16x32xf32, #tpu.memory_space<vmem>>, %arg4: memref<96x32xf32, #tpu.memory_space<vmem>>, %arg5: memref<16x96xf32, #tpu.memory_space<vmem>>, %arg6: memref<16x96xf32, #tpu.memory_space<vmem>>) attributes {dimension_semantics = [#tpu.dimension_semantics<parallel>, #tpu.dimension_semantics<parallel>, #tpu.dimension_semantics<arbitrary>], iteration_bounds = array<i64: 1, 1, 1>, scalar_prefetch = 0 : i64, scratch_operands = 1 : i64, tpu.core_type = #tpu.core_type<tc>, window_params = [{transform_indices = @transform_0, window_bounds = array<i64: 16, 32>}, {transform_indices = @transform_1, window_bounds = array<i64: 96, 32>}, {transform_indices = @transform_2, window_bounds = array<i64: 16, 96>}]} {
    %c0_i32 = arith.constant 0 : i32
    %0 = arith.cmpi eq, %arg2, %c0_i32 : i32
    %1 = arith.extui %0 : i1 to i32
    %c0_i32_0 = arith.constant 0 : i32
    %2 = arith.cmpi ne, %1, %c0_i32_0 : i32
    scf.if %2 {
      %cst_10 = arith.constant 0.000000e+00 : f32
      %12 = vector.broadcast %cst_10 : f32 to vector<16x96xf32>
      %c0_11 = arith.constant 0 : index
      %c0_12 = arith.constant 0 : index
      %13 = vector.load %arg6[%c0_11, %c0_12] : memref<16x96xf32, #tpu.memory_space<vmem>>, vector<16x96xf32>
      tpu.vector_store %arg6[%c0_11, %c0_12], %12 {strides = array<i32>} : memref<16x96xf32, #tpu.memory_space<vmem>>, vector<16x96xf32>,
    } else {
    }
    %c0 = arith.constant 0 : index
    %c0_1 = arith.constant 0 : index
    %3 = vector.load %arg6[%c0, %c0_1] : memref<16x96xf32, #tpu.memory_space<vmem>>, vector<16x96xf32>
    %c0_2 = arith.constant 0 : index
    %c0_3 = arith.constant 0 : index
    %4 = vector.load %arg3[%c0_2, %c0_3] : memref<16x32xf32, #tpu.memory_space<vmem>>, vector<16x32xf32>
    %c0_4 = arith.constant 0 : index
    %c0_5 = arith.constant 0 : index
    %5 = vector.load %arg4[%c0_4, %c0_5] : memref<96x32xf32, #tpu.memory_space<vmem>>, vector<96x32xf32>
    %cst = arith.constant dense<0.000000e+00> : vector<16x96xf32>
    %6 = tpu.matmul %4, %5, %cst {dimension_numbers = #tpu.dot_dimension_numbers<[1], [1], [0], [0], [0, 0, 1, 0], [], []>} : vector<16x32xf32>, vector<96x32xf32>, vector<16x96xf32> -> vector<16x96xf32>
    %7 = arith.addf %3, %6 : vector<16x96xf32>
    %c0_6 = arith.constant 0 : index
    %c0_7 = arith.constant 0 : index
    %8 = vector.load %arg6[%c0_6, %c0_7] : memref<16x96xf32, #tpu.memory_space<vmem>>, vector<16x96xf32>
    tpu.vector_store %arg6[%c0_6, %c0_7], %7 {strides = array<i32>} : memref<16x96xf32, #tpu.memory_space<vmem>>, vector<16x96xf32>,
    %c0_i32_8 = arith.constant 0 : i32
    %9 = arith.cmpi eq, %arg2, %c0_i32_8 : i32
    %10 = arith.extui %9 : i1 to i32
    %c0_i32_9 = arith.constant 0 : i32
    %11 = arith.cmpi ne, %10, %c0_i32_9 : i32
    scf.if %11 {
      %c0_10 = arith.constant 0 : index
      %c0_11 = arith.constant 0 : index
      %12 = vector.load %arg6[%c0_10, %c0_11] : memref<16x96xf32, #tpu.memory_space<vmem>>, vector<16x96xf32>
      %c0_12 = arith.constant 0 : index
      %c0_13 = arith.constant 0 : index
      %13 = vector.load %arg5[%c0_12, %c0_13] : memref<16x96xf32, #tpu.memory_space<vmem>>, vector<16x96xf32>
      tpu.vector_store %arg5[%c0_12, %c0_13], %12 {strides = array<i32>} : memref<16x96xf32, #tpu.memory_space<vmem>>, vector<16x96xf32>,
    } else {
    }
    return
  }
  func.func @transform_0(%arg0: i32, %arg1: i32, %arg2: i32) -> (i32, i32) {
    %c0_i32 = arith.constant 0 : i32
    return %arg0, %arg2 : i32, i32
  }
  func.func @transform_1(%arg0: i32, %arg1: i32, %arg2: i32) -> (i32, i32) {
    %c0_i32 = arith.constant 0 : i32
    return %arg1, %arg2 : i32, i32
  }
  func.func @transform_2(%arg0: i32, %arg1: i32, %arg2: i32) -> (i32, i32) {
    %c0_i32 = arith.constant 0 : i32
    return %arg0, %arg1 : i32, i32
  }
}

</mosaic_0001>

<bundles_post_ra>
// kernel: tpu_custom_call.1
= control target key start
LH: loop header
LB: loop body
LE: loop exit
PB: predicated region body
PF: predicated region fallthrough
CT: control target
= control target key end

     0   :  { %vm35_vm0 = vcmask 261120   ;;  %s283_s0 = inlined_call_operand.vmem [shape: f32[16,32], index: 0, kind: input, shape index: {}]   ;;  %s284_s1 = inlined_call_operand.vmem [shape: f32[96,32], index: 1, kind: input, shape index: {}]   ;;  %s285_s2 = inlined_call_operand.hbm [shape: f32[16,96], index: 2, kind: output, shape index: {}]  }
   0x1   :  { %v34_v0 = vld [vmem:[%s284_s1 + $0x58] sm:$0xff]  ;;  %v33_v1 = vld [vmem:[%s284_s1 + $0x50] sm:$0xff] }
   0x2   :  { %131 = vmatpush.xpose.msk.msra.mxu0 %vm35_vm0, %v34_v0  ;;  %145 = vmatpush.xpose.msk.msra.mxu1 %vm35_vm0, %v34_v0 }
   0x3   :  { %7 = vsyncpa [#allocation4], 0  ;;  %v32_v2 = vld [vmem:[%s284_s1 + $0x48] sm:$0xff]  ;;  %v31_v3 = vld [vmem:[%s284_s1 + $0x40] sm:$0xff]  ;;  %vm16_vm1 = vcmask 785408   ;;  %v187_v5 = vmov 0.0  }
   0x4   :  { %v30_v4 = vld [vmem:[%s284_s1 + $0x38] sm:$0xff]  ;;  %17 = vst.msk [vmem:[#allocation2] sm:$0xff] %vm16_vm1, %v187_v5  ;;  %v29_v6 = vld [vmem:[%s284_s1 + $0x30] sm:$0xff]  ;;  %v28_v7 = vld [vmem:[%s284_s1 + $0x28] sm:$0xff]  ;;  %s189_s12 = smov 128   ;;  %s190_s13 = smov 8  }
   0x5   :  { %18 = vst.msk [vmem:[#allocation2 + $0x8] sm:$0xff] %vm16_vm1, %v187_v5  ;;  %v27_v8 = vld [vmem:[%s284_s1 + $0x20] sm:$0xff]  ;;  %v26_v9 = vld [vmem:[%s284_s1 + $0x18] sm:$0xff]  ;;  %v25_v10 = vld [vmem:[%s284_s1 + $0x10] sm:$0xff] }
   0x6   :  { %132 = vmatpush.xpose.msk.msra.mxu0 %vm35_vm0, %v33_v1  ;;  %146 = vmatpush.xpose.msk.msra.mxu1 %vm35_vm0, %v33_v1  ;;  %v24_v11 = vld [vmem:[%s284_s1 + $0x8] sm:$0xff]  ;;  %v23_v12 = vld [vmem:[%s284_s1] sm:$0xff]  ;;  %s188_s1 = smov [#allocation3]  }
   0x7   :  { %v21_v13 = vld [vmem:[%s283_s0] sm:$0xff]  ;;  %v22_v14 = vld [vmem:[%s283_s0 + $0x8] sm:$0xff]  ;;  %s117_s9 = sshll.u32 %s188_s1, 4  ;;  %s119_s0 = sshll.u32 %s285_s2, 4  ;;  %s118_s9 = int_to_ptr.vmem [resolvable:$true] %s117_s9  ;;  %s120_s0 = int_to_ptr.hbm [resolvable:$true] %s119_s0 }
   0xa   :  { %133 = vmatpush.xpose.msk.msra.mxu0 %vm35_vm0, %v32_v2  ;;  %147 = vmatpush.xpose.msk.msra.mxu1 %vm35_vm0, %v32_v2 }
   0xb   :  { %v19_v15 = vld [vmem:[#allocation2] sm:$0xff] }
   0xc   :  { %v20_v16 = vld [vmem:[#allocation2 + $0x8] sm:$0xff] }
   0xe   :  { %134 = vmatpush.xpose.msk.msra.mxu0 %vm35_vm0, %v31_v3  ;;  %148 = vmatpush.xpose.msk.msra.mxu1 %vm35_vm0, %v31_v3 }
  0x12   :  { %135 = vmatpush.xpose.msk.msra.mxu0 %vm35_vm0, %v30_v4  ;;  %149 = vmatpush.xpose.msk.msra.mxu1 %vm35_vm0, %v30_v4 }
  0x16   :  { %136 = vmatpush.xpose.msk.msra.mxu0 %vm35_vm0, %v29_v6  ;;  %150 = vmatpush.xpose.msk.msra.mxu1 %vm35_vm0, %v29_v6 }
  0x1a   :  { %137 = vmatpush.xpose.msk.msra.mxu0 %vm35_vm0, %v28_v7  ;;  %151 = vmatpush.xpose.msk.msra.mxu1 %vm35_vm0, %v28_v7 }
  0x1e   :  { %138 = vmatpush.xpose.msk.msra.mxu0 %vm35_vm0, %v27_v8  ;;  %152 = vmatpush.xpose.msk.msra.mxu1 %vm35_vm0, %v27_v8 }
  0x22   :  { %139 = vmatpush.xpose.msk.msra.mxu0 %vm35_vm0, %v26_v9  ;;  %153 = vmatpush.xpose.msk.msra.mxu1 %vm35_vm0, %v26_v9 }
  0x26   :  { %140 = vmatpush.xpose.msk.msra.mxu0 %vm35_vm0, %v25_v10  ;;  %154 = vmatpush.xpose.msk.msra.mxu1 %vm35_vm0, %v25_v10 }
  0x2a   :  { %141 = vmatpush.xpose.msk.msra.mxu0 %vm35_vm0, %v24_v11  ;;  %155 = vmatpush.xpose.msk.msra.mxu1 %vm35_vm0, %v24_v11 }
  0x2e   :  { %142 = vmatpush.xpose.msk.msra.mxu0 %vm35_vm0, %v23_v12  ;;  %156 = vmatpush.xpose.msk.msra.mxu1 %vm35_vm0, %v23_v12 }
  0x31   :  { %143 = vmatmul.msk.f32.vlgmr.msra.gmra.mxu0 %vm35_vm0, %v21_v13  ;;  %144 = vmatmul.msk.f32.vlgmr.msra.gmra.mxu1 %vm35_vm0, %v22_v14 }
  0xae   :  { %v95_v17 = vpop.f32.mrf.mxu0  ;;  %v98_v18 = vpop.f32.mrf.mxu1 }
  0xaf   :  { %v101_v19 = vadd.f32 %v95_v17, %v19_v15  ;;  %v102_v20 = vadd.f32 %v98_v18, %v20_v16 }
  0xb1   :  { %104 = vst.msk [vmem:[#allocation2] sm:$0xff] %vm16_vm1, %v101_v19 }
  0xb2   :  { %105 = vst.msk [vmem:[#allocation2 + $0x8] sm:$0xff] %vm16_vm1, %v102_v20 }
  0xb8   :  { %v109_v21 = vld [vmem:[#allocation2] sm:$0xff] }
  0xb9   :  { %v110_v22 = vld [vmem:[#allocation2 + $0x8] sm:$0xff]  ;;  %111 = vst.msk [vmem:[#allocation3] sm:$0xff] %vm16_vm1, %v109_v21 }
  0xba   :  { %112 = vst.msk [vmem:[#allocation3 + $0x8] sm:$0xff] %vm16_vm1, %v110_v22 }
  0xbb   :  { %125 = dma.vmem_to_hbm [thread:$0]  %s118_s9, 256, %s120_s0, [#allocation4], %s189_s12, %s189_s12, %s190_s13  }
  0xbc   :  { %185 = dma.done.wait [#allocation4], 256  }
  0xbd   :  { %186 = vsyncadd [#allocation4], 4294967040 }
  0xbe   :  { %130 = vsyncpa [#allocation4], 1 }

</bundles_post_ra>
